<compile_context>
chip_gen: v5e
topology: v5e:2x2
jax: 0.10.0
libtpu: 0.0.40
codegen_flags: <defaults>
</compile_context>

<pallas_src>
import numpy as np
import jax
import jax.numpy as jnp
from jax.experimental import pallas as pl
from jax.experimental.pallas import tpu as pltpu

# ---- small, forward-consistent sizes ----
BATCH = 256        # n
NUM_FEATURES = 32  # num_features
RUNITS = 16        # runits[0]
NUM_EXPERTS = 4    # num_experts
NUM_TASKS = 3      # num_tasks

_TE = NUM_TASKS * NUM_EXPERTS                 # 12 output rows (task-major, expert-minor)
_EXP_OFF = ((_TE + 7) // 8) * 8               # 16: expert block starts sublane-tile aligned
_ALIGN_PAD = _EXP_OFF - _TE                   # 4 zero rows between gate and expert blocks
_ROWS = _EXP_OFF + _TE                        # 28 fused-weight rows
MAX_TILE_N = 1024                             # lane-tile cap if batch scales


def mmoeex_census_kernel(x_ref, w_ref, bcol_ref, rowb_ref, gsum_ref, tbcol_ref, out_ref):
    """One lane (batch) tile; everything is batch-on-lanes (lane-dense).

    x_ref     : (F, TILE_N)       transposed activations (batch on lanes)
    w_ref     : (28, F)           fused [gates | pad | tiled composed experts] (resident)
    bcol_ref  : (28, 1)           fused [gate bias | 0 | tiled expert_output bias] column
    rowb_ref  : (1, TILE_N)       expert_bias row-quirk as a lane vector (lanes 0..E-1)
    gsum_ref  : (12, 12)          block-diagonal ones (per-task group-sum + broadcast)
    tbcol_ref : (12, 1)           task_bias repeated E times per task
    out_ref   : (12, TILE_N)      row t*E+e, lane j  ->  final_outputs[t, j, e]
    """
    # One MXU pass: all gate logits + all (task-tiled) composed expert outputs.
    fused = jnp.dot(w_ref[...], x_ref[...],
                    preferred_element_type=jnp.float32) + bcol_ref[...]   # (28, TILE_N)

    # Gate logits (rows 0..11) and tiled expert outputs (rows 16..27).
    g = fused[:_TE, :]                                                    # (12, TILE_N)
    eo = jnp.maximum(fused[_EXP_OFF:_EXP_OFF + _TE, :] + rowb_ref[...], 0.0)

    # Vectorized per-task softmax over experts (sublane groups of E):
    # per-lane shift (softmax is invariant to a constant shift within each group),
    # one exp, group sums + broadcast via a block-diagonal ones matmul (idle MXU),
    # one approximate reciprocal (EUP slot).
    g = g - jnp.max(g, axis=0, keepdims=True)
    p = jnp.exp(g)
    denom = jnp.dot(gsum_ref[...], p, preferred_element_type=jnp.float32)
    gate = p * pl.reciprocal(denom, approx=True)

    # Gate * expert + task bias, one lane-dense store.
    out_ref[...] = gate * eo + tbcol_ref[...]


def mmoeex_census_forward(x, w_fused_t, b_fused_col, expert_bias, gsum, tb_col,
                          *, max_tile_n=MAX_TILE_N):
    """x: (N, F) -> final_outputs (T, N, E), matching the PyTorch census branch."""
    n, f = x.shape
    # Lane tiling of the batch: single tile at toy sizes, 1024-wide tiles if it grows.
    tile_n = min(((n + 127) // 128) * 128, max_tile_n)
    n_blocks = (n + tile_n - 1) // tile_n
    n_pad = n_blocks * tile_n

    if n_pad != n:
        x = jnp.pad(x, ((0, n_pad - n), (0, 0)))
    xt = x.T                                                      # (F, n_pad)

    # PyTorch quirk: expert_bias[i] is added to global batch ROW i of expert_outputs.
    # In the transposed layout that is lane i (for i < E), applied to every expert row.
    # (Note: PyTorch would error if n < num_experts; here n >= E is assumed.)
    rowb = jnp.zeros((1, n_pad), jnp.float32).at[0, :NUM_EXPERTS].set(expert_bias)

    out = pl.pallas_call(
        mmoeex_census_kernel,
        out_shape=jax.ShapeDtypeStruct((_TE, n_pad), jnp.float32),
        grid=(n_blocks,),
        in_specs=[
            pl.BlockSpec((f, tile_n), lambda i: (0, i)),       # x^T: lane(batch)-tiled
            pl.BlockSpec((_ROWS, f), lambda i: (0, 0)),        # fused weights: resident
            pl.BlockSpec((_ROWS, 1), lambda i: (0, 0)),        # fused bias column
            pl.BlockSpec((1, tile_n), lambda i: (0, i)),       # expert_bias lane quirk
            pl.BlockSpec((_TE, _TE), lambda i: (0, 0)),        # group-sum matrix
            pl.BlockSpec((_TE, 1), lambda i: (0, 0)),          # task-bias column
        ],
        out_specs=pl.BlockSpec((_TE, tile_n), lambda i: (0, i)),
        compiler_params=pltpu.CompilerParams(
            dimension_semantics=("parallel",)),                # no-op at grid=(1,)
    )(xt, w_fused_t, b_fused_col, rowb, gsum, tb_col)

    # (T*E, N) lane-dense slab -> PyTorch (T, N, E) final_outputs layout.
    out = out[:, :n].reshape(NUM_TASKS, NUM_EXPERTS, n)
    return jnp.transpose(out, (0, 2, 1))


def build_raw_params(key):
    """Deterministic synthetic parameters matching MMoEEx.__init__ (census path)."""
    keys = jax.random.split(key, 4)

    # expert_kernels: (E, F, R) ~ torch.rand -> U[0,1)
    wk = jax.random.uniform(keys[0], (NUM_EXPERTS, NUM_FEATURES, RUNITS),
                            dtype=jnp.float32)

    # expert_output[i] = nn.Linear(R, 1): weight^T column (R,), bias scalar.
    lim = 1.0 / np.sqrt(RUNITS)
    wout = jax.random.uniform(keys[1], (RUNITS, NUM_EXPERTS),
                              minval=-lim, maxval=lim, dtype=jnp.float32)
    bout = jax.random.uniform(keys[2], (1, NUM_EXPERTS),
                              minval=-lim, maxval=lim, dtype=jnp.float32)

    # expert_bias = zeros(num_experts)  (seqlen is None)
    expert_bias = jnp.zeros((NUM_EXPERTS,), dtype=jnp.float32)

    # gate_kernels: (T, F, E) ~ torch.rand, then exclusivity zeroing.
    gk = jax.random.uniform(keys[3], (NUM_TASKS, NUM_FEATURES, NUM_EXPERTS),
                            dtype=jnp.float32)
    to_add = int(NUM_EXPERTS * 0.5)                      # prob_exclusivity=0.5
    exclusivity = np.full((NUM_EXPERTS,), NUM_TASKS + 1, dtype=np.int64)
    fixed_tasks = [1, 0, 2, 1]                           # deterministic randint stand-in
    for e in range(to_add):
        exclusivity[e] = fixed_tasks[e]
    for e, t in enumerate(exclusivity):                  # type == 'exclusivity'
        if t < NUM_TASKS + 1:
            for task in range(NUM_TASKS):
                if task != t:
                    gk = gk.at[task, :, e].set(0.0)

    gb = jnp.zeros((NUM_TASKS, 1, NUM_EXPERTS), dtype=jnp.float32)   # gate_bias
    tb = jnp.zeros((NUM_TASKS,), dtype=jnp.float32)                  # task_bias
    return wk, wout, bout, expert_bias, gk, gb, tb


def build_fused_params(wk, wout, bout, gk, gb, tb):
    """One-time (init-style) preprocessing for the fused, transposed kernel."""
    # Composed expert weight row e = wk[e] @ wout[:, e]           -> (E, F)
    w_exp = jnp.einsum('efr,re->ef', wk, wout)
    w_exp_tiled = jnp.tile(w_exp, (NUM_TASKS, 1))                 # (T*E, F), row t*E+e
    # Gate weights, task-major expert-minor rows                  -> (T*E, F)
    w_gate = jnp.transpose(gk, (0, 2, 1)).reshape(_TE, NUM_FEATURES)
    pad_w = jnp.zeros((_ALIGN_PAD, NUM_FEATURES), jnp.float32)
    w_fused_t = jnp.concatenate([w_gate, pad_w, w_exp_tiled], axis=0)   # (28, F)

    # Fused bias column: [gate bias | 0 | tiled expert_output bias].
    b_gate = gb.reshape(NUM_TASKS, NUM_EXPERTS).reshape(_TE, 1)
    b_exp = jnp.tile(bout.reshape(1, NUM_EXPERTS), (NUM_TASKS, 1)).reshape(_TE, 1)
    b_fused = jnp.concatenate(
        [b_gate, jnp.zeros((_ALIGN_PAD, 1), jnp.float32), b_exp], axis=0)   # (28, 1)

    # Block-diagonal ones: per-task group sums + broadcast back in one matmul.
    gsum = jnp.kron(jnp.eye(NUM_TASKS, dtype=jnp.float32),
                    jnp.ones((NUM_EXPERTS, NUM_EXPERTS), jnp.float32))      # (12, 12)

    # task_bias repeated per expert row (lane-broadcast final add).
    tb_col = jnp.repeat(tb, NUM_EXPERTS).reshape(_TE, 1)
    return w_fused_t, b_fused, gsum, tb_col


def reference_forward(x, wk, wout, bout, expert_bias, gk, gb, tb):
    """Pure-JAX reference mirroring the PyTorch 'census' forward (raw params)."""
    cols = []
    for e in range(NUM_EXPERTS):
        aux = x @ wk[e]
        cols.append(aux @ wout[:, e:e + 1] + bout[0, e])
    eo = jnp.concatenate(cols, axis=1)                   # (N, E)
    for i in range(NUM_EXPERTS):                         # row-wise expert_bias quirk
        eo = eo.at[i].add(expert_bias[i])
    eo = jax.nn.relu(eo)
    outs = []
    for t in range(NUM_TASKS):
        g = x @ gk[t] + gb[t]
        g = jax.nn.softmax(g, axis=-1)
        outs.append(g * eo + tb[t])
    return jnp.stack(outs, axis=0)                       # (T, N, E)


if __name__ == "__main__":
    key = jax.random.PRNGKey(0)
    kx, kp = jax.random.split(key)
    x = jax.random.normal(kx, (BATCH, NUM_FEATURES), dtype=jnp.float32)

    wk, wout, bout, expert_bias, gk, gb, tb = build_raw_params(kp)
    w_fused_t, b_fused, gsum, tb_col = build_fused_params(wk, wout, bout, gk, gb, tb)

    out = mmoeex_census_forward(x, w_fused_t, b_fused, expert_bias, gsum, tb_col)
    out = jax.block_until_ready(out)

    ref = reference_forward(x, wk, wout, bout, expert_bias, gk, gb, tb)
    assert out.shape == (NUM_TASKS, BATCH, NUM_EXPERTS)
    # Tolerance loosened vs f32 reference: pl.reciprocal(approx=True) in the softmax
    # + exact linear pre-composition of wk @ wout on the wrapper side.
    np.testing.assert_allclose(np.asarray(out), np.asarray(ref),
                               rtol=5e-3, atol=5e-3)
    print("KERNEL_OK")
</pallas_src>

<mosaic_0001>
module attributes {stable_mosaic.version = 11 : i64} {
  func.func @mmoeex_census_kernel(%arg0: i32, %arg1: memref<32x256xf32, #tpu.memory_space<vmem>>, %arg2: memref<28x32xf32, #tpu.memory_space<vmem>>, %arg3: memref<28x1xf32, #tpu.memory_space<vmem>>, %arg4: memref<1x256xf32, #tpu.memory_space<vmem>>, %arg5: memref<12x12xf32, #tpu.memory_space<vmem>>, %arg6: memref<12x1xf32, #tpu.memory_space<vmem>>, %arg7: memref<12x256xf32, #tpu.memory_space<vmem>>) attributes {dimension_semantics = [#tpu.dimension_semantics<parallel>], iteration_bounds = array<i64: 1>, scalar_prefetch = 0 : i64, scratch_operands = 0 : i64, tpu.core_type = #tpu.core_type<tc>, window_params = [{transform_indices = @transform_0, window_bounds = array<i64: 32, 256>}, {pipeline_mode = #tpu.pipeline_mode<synchronous>, transform_indices = @transform_1, window_bounds = array<i64: 28, 32>}, {pipeline_mode = #tpu.pipeline_mode<synchronous>, transform_indices = @transform_2, window_bounds = array<i64: 28, 1>}, {transform_indices = @transform_3, window_bounds = array<i64: 1, 256>}, {pipeline_mode = #tpu.pipeline_mode<synchronous>, transform_indices = @transform_4, window_bounds = array<i64: 12, 12>}, {pipeline_mode = #tpu.pipeline_mode<synchronous>, transform_indices = @transform_5, window_bounds = array<i64: 12, 1>}, {transform_indices = @transform_6, window_bounds = array<i64: 12, 256>}]} {
    %c0 = arith.constant 0 : index
    %c0_0 = arith.constant 0 : index
    %0 = vector.load %arg2[%c0, %c0_0] : memref<28x32xf32, #tpu.memory_space<vmem>>, vector<28x32xf32>
    %c0_1 = arith.constant 0 : index
    %c0_2 = arith.constant 0 : index
    %1 = vector.load %arg1[%c0_1, %c0_2] : memref<32x256xf32, #tpu.memory_space<vmem>>, vector<32x256xf32>
    %cst = arith.constant dense<0.000000e+00> : vector<28x256xf32>
    %2 = tpu.matmul %0, %1, %cst {dimension_numbers = #tpu.dot_dimension_numbers<[1], [0], [0], [1], [0, 0, 1, 1], [], []>} : vector<28x32xf32>, vector<32x256xf32>, vector<28x256xf32> -> vector<28x256xf32>
    %c0_3 = arith.constant 0 : index
    %c0_4 = arith.constant 0 : index
    %3 = vector.load %arg3[%c0_3, %c0_4] : memref<28x1xf32, #tpu.memory_space<vmem>>, vector<28x1xf32>
    %4 = vector.broadcast %3 : vector<28x1xf32> to vector<28x256xf32>
    %5 = arith.addf %2, %4 : vector<28x256xf32>
    %6 = vector.extract_strided_slice %5 {offsets = [0, 0], sizes = [12, 256], strides = [1, 1]} : vector<28x256xf32> to vector<12x256xf32>
    %7 = vector.extract_strided_slice %5 {offsets = [16, 0], sizes = [12, 256], strides = [1, 1]} : vector<28x256xf32> to vector<12x256xf32>
    %c0_5 = arith.constant 0 : index
    %c0_6 = arith.constant 0 : index
    %8 = vector.load %arg4[%c0_5, %c0_6] : memref<1x256xf32, #tpu.memory_space<vmem>>, vector<1x256xf32>
    %9 = vector.broadcast %8 : vector<1x256xf32> to vector<12x256xf32>
    %10 = arith.addf %7, %9 : vector<12x256xf32>
    %cst_7 = arith.constant 0.000000e+00 : f32
    %11 = vector.broadcast %cst_7 : f32 to vector<12x256xf32>
    %12 = arith.maximumf %10, %11 : vector<12x256xf32>
    %cst_8 = arith.constant dense<0xFF800000> : vector<256xf32>
    %13 = vector.multi_reduction <maximumf>, %6, %cst_8 [0] : vector<12x256xf32> to vector<256xf32>
    %14 = vector.shape_cast %13 : vector<256xf32> to vector<1x256xf32>
    %15 = vector.broadcast %14 : vector<1x256xf32> to vector<12x256xf32>
    %16 = arith.subf %6, %15 : vector<12x256xf32>
    %17 = math.exp %16 : vector<12x256xf32>
    %c0_9 = arith.constant 0 : index
    %c0_10 = arith.constant 0 : index
    %18 = vector.load %arg5[%c0_9, %c0_10] : memref<12x12xf32, #tpu.memory_space<vmem>>, vector<12x12xf32>
    %cst_11 = arith.constant dense<0.000000e+00> : vector<12x256xf32>
    %19 = tpu.matmul %18, %17, %cst_11 {dimension_numbers = #tpu.dot_dimension_numbers<[1], [0], [0], [1], [0, 0, 1, 1], [], []>} : vector<12x12xf32>, vector<12x256xf32>, vector<12x256xf32> -> vector<12x256xf32>
    %20 = tpu.reciprocal %19 {approx = true} : vector<12x256xf32> -> vector<12x256xf32>
    %21 = arith.mulf %17, %20 : vector<12x256xf32>
    %22 = arith.mulf %21, %12 : vector<12x256xf32>
    %c0_12 = arith.constant 0 : index
    %c0_13 = arith.constant 0 : index
    %23 = vector.load %arg6[%c0_12, %c0_13] : memref<12x1xf32, #tpu.memory_space<vmem>>, vector<12x1xf32>
    %24 = vector.broadcast %23 : vector<12x1xf32> to vector<12x256xf32>
    %25 = arith.addf %22, %24 : vector<12x256xf32>
    %c0_14 = arith.constant 0 : index
    %c0_15 = arith.constant 0 : index
    %26 = vector.load %arg7[%c0_14, %c0_15] : memref<12x256xf32, #tpu.memory_space<vmem>>, vector<12x256xf32>
    tpu.vector_store %arg7[%c0_14, %c0_15], %25 {strides = array<i32>} : memref<12x256xf32, #tpu.memory_space<vmem>>, vector<12x256xf32>,
    return
  }
  func.func @transform_0(%arg0: i32) -> (i32, i32) {
    %c0_i32 = arith.constant 0 : i32
    %c0_i32_0 = arith.constant 0 : i32
    return %c0_i32, %arg0 : i32, i32
  }
  func.func @transform_1(%arg0: i32) -> (i32, i32) {
    %c0_i32 = arith.constant 0 : i32
    %c0_i32_0 = arith.constant 0 : i32
    %c0_i32_1 = arith.constant 0 : i32
    return %c0_i32, %c0_i32_0 : i32, i32
  }
  func.func @transform_2(%arg0: i32) -> (i32, i32) {
    %c0_i32 = arith.constant 0 : i32
    %c0_i32_0 = arith.constant 0 : i32
    %c0_i32_1 = arith.constant 0 : i32
    return %c0_i32, %c0_i32_0 : i32, i32
  }
  func.func @transform_3(%arg0: i32) -> (i32, i32) {
    %c0_i32 = arith.constant 0 : i32
    %c0_i32_0 = arith.constant 0 : i32
    return %c0_i32, %arg0 : i32, i32
  }
  func.func @transform_4(%arg0: i32) -> (i32, i32) {
    %c0_i32 = arith.constant 0 : i32
    %c0_i32_0 = arith.constant 0 : i32
    %c0_i32_1 = arith.constant 0 : i32
    return %c0_i32, %c0_i32_0 : i32, i32
  }
  func.func @transform_5(%arg0: i32) -> (i32, i32) {
    %c0_i32 = arith.constant 0 : i32
    %c0_i32_0 = arith.constant 0 : i32
    %c0_i32_1 = arith.constant 0 : i32
    return %c0_i32, %c0_i32_0 : i32, i32
  }
  func.func @transform_6(%arg0: i32) -> (i32, i32) {
    %c0_i32 = arith.constant 0 : i32
    %c0_i32_0 = arith.constant 0 : i32
    return %c0_i32, %arg0 : i32, i32
  }
}

</mosaic_0001>

<bundles_post_ra>
// kernel: tpu_custom_call.1
= control target key start
LH: loop header
LB: loop body
LE: loop exit
PB: predicated region body
PF: predicated region fallthrough
CT: control target
= control target key end

     0   :  { %11 = vsyncpa [#allocation3], 0  ;;  %s546_s0 = inlined_call_operand.hbm [shape: f32[32,256], index: 0, kind: input, shape index: {}]   ;;  %s547_s1 = inlined_call_operand.vmem [shape: f32[28,32], index: 1, kind: input, shape index: {}]   ;;  %s548_s2 = inlined_call_operand.vmem [shape: f32[28,1], index: 2, kind: input, shape index: {}]   ;;  %s549_s3 = inlined_call_operand.hbm [shape: f32[1,256], index: 3, kind: input, shape index: {}]   ;;  %s550_s4 = inlined_call_operand.vmem [shape: f32[12,12], index: 4, kind: input, shape index: {}]   ;;  %s551_s5 = inlined_call_operand.vmem [shape: f32[12,1], index: 5, kind: input, shape index: {}]   ;;  %s552_s6 = inlined_call_operand.hbm [shape: f32[12,256], index: 6, kind: output, shape index: {}]  }
   0x1   :  { %12 = vsyncpa [#allocation6], 0 }
   0x2   :  { %13 = vsyncpa [#allocation4], 0  ;;  %s18_s23 = sshll.u32 %s546_s0, 4  ;;  %s442_s24 = smov [#allocation2]   ;;  %s19_s23 = int_to_ptr.hbm [resolvable:$true] %s18_s23 }
   0x3   :  { %s20_s25 = sshll.u32 %s442_s24, 4  ;;  %s36_s28 = sshll.u32 %s549_s3, 4  ;;  %s21_s25 = int_to_ptr.vmem [resolvable:$true] %s20_s25  ;;  %s37_s28 = int_to_ptr.hbm [resolvable:$true] %s36_s28 }
   0x4   :  { %s443_s29 = smov 256   ;;  %s444_s30 = smov 16  }
   0x5   :  { %26 = dma.hbm_to_vmem [thread:$0]  %s19_s23, 1024, %s21_s25, [#allocation3], %s443_s29, %s443_s29, %s444_s30  }
   0x6   :  { %s445_s7 = smov [#allocation5]  }
   0x7   :  { %s38_s8 = sshll.u32 %s445_s7, 4  ;;  %s39_s8 = int_to_ptr.vmem [resolvable:$true] %s38_s8 }
   0x8   :  { %41 = dma.hbm_to_vmem [thread:$0]  %s37_s28, 32, %s39_s8, [#allocation6]  }
   0x9   :  { %436 = dma.done.wait [#allocation3], 1024  }
   0xa   :  { %437 = vsyncadd [#allocation3], 4294966272 }
   0xb   :  { %438 = dma.done.wait [#allocation6], 32  }
   0xc   :  { %439 = vsyncadd [#allocation6], 4294967264  ;;  %v446_v0 = vmov 0   ;;  %v64_v1 = vld [vmem:[#allocation2 + $0x30] sm:$0xff]  ;;  %v65_v2 = vld [vmem:[#allocation2 + $0x38] sm:$0xff]  ;;  %vm90_vm0 = vcmask 261120  }
   0xd   :  { %345 = vset.pattern.permute.xlu0 %v446_v0  ;;  %346 = vset.pattern.permute.xlu1 %v446_v0  ;;  %v62_v3 = vld [vmem:[#allocation2 + $0x20] sm:$0xff]  ;;  %v63_v4 = vld [vmem:[#allocation2 + $0x28] sm:$0xff]  ;;  %v60_v5 = vld [vmem:[#allocation2 + $0x10] sm:$0xff]  ;;  %vm175_vm1 = vcmask 1043456   ;;  %vm206_vm2 = vcmask 97280   ;;  %s303_s0 = sshll.u32 %s552_s6, 4  ;;  %s304_s0 = int_to_ptr.hbm [resolvable:$true] %s303_s0 }
   0xe   :  { %347 = vset.pattern.permute.xlu2 %v446_v0  ;;  %115 = vmatpush.msra.mxu0 %v64_v1  ;;  %v61_v6 = vld [vmem:[#allocation2 + $0x18] sm:$0xff]  ;;  %v67_v7 = vld [vmem:[%s548_s2 + $0x8] sm:$0xff]  ;;  %v58_v8 = vld [vmem:[#allocation2] sm:$0xff] }
   0xf   :  { %144 = vmatpush.msra.mxu1 %v65_v2  ;;  %331 = vmatpush.msra.mxu2 %v64_v1  ;;  %v59_v9 = vld [vmem:[#allocation2 + $0x8] sm:$0xff]  ;;  %v54_v10 = vld [vmem:[%s547_s1] sm:$0xff]  ;;  %v57_v14 = vld [vmem:[%s547_s1 + $0x18] sm:$0xf] }
  0x10   :  { %335 = vmatpush.msra.mxu3 %v65_v2  ;;  %116 = vmatpush.msra.mxu0 %v62_v3  ;;  %v66_v11 = vld [vmem:[%s548_s2] sm:$0xff]  ;;  %v55_v12 = vld [vmem:[%s547_s1 + $0x8] sm:$0xff]  ;;  %v68_v22 = vld [vmem:[%s548_s2 + $0x10] sm:$0xff] }
  0x11   :  { %145 = vmatpush.msra.mxu1 %v63_v4  ;;  %77 = vperm.xlu0 %345, %v67_v7   ;;  %v56_v33 = vld [vmem:[%s547_s1 + $0x10] sm:$0xff]  ;;  %v69_v34 = vld [vmem:[%s548_s2 + $0x18] sm:$0xf]  ;;  %v277_v35 = vld [vmem:[%s551_s5] sm:$0xff] }
  0x12   :  { %332 = vmatpush.msra.mxu2 %v62_v3  ;;  %117 = vmatpush.msra.mxu0 %v60_v5  ;;  %v278_v44 = vld [vmem:[%s551_s5 + $0x8] sm:$0xf]  ;;  %v204_v55 = vld [vmem:[%s550_s4] sm:$0xff] }
  0x13   :  { %146 = vmatpush.msra.mxu1 %v61_v6  ;;  %336 = vmatpush.msra.mxu3 %v63_v4  ;;  %v205_v58 = vld [vmem:[%s550_s4 + $0x8] sm:$0xf]  ;;  %v161_v0 = vld [vmem:[#allocation5] sm:$0x3]  ;;  %s447_s4 = smov [#allocation7]  }
  0x14   :  { %333 = vmatpush.msra.mxu2 %v60_v5  ;;  %118 = vmatpush.msra.mxu0 %v58_v8  ;;  %v163_v3 = vperm.slane %v161_v0, 0  ;;  %v164_v5 = vperm.slane %v161_v0, 1  ;;  %s301_s28 = sshll.u32 %s447_s4, 4  ;;  %s302_s28 = int_to_ptr.vmem [resolvable:$true] %s301_s28 }
  0x15   :  { %147 = vmatpush.msra.mxu1 %v59_v9  ;;  %317 = vmatmul.msk.f32.vlgmr.msra.gmra.mxu0 %vm90_vm0, %v54_v10 }
  0x16   :  { %321 = vmatmul.msk.f32.vlgmr.msra.gmra.mxu1 %vm90_vm0, %v54_v10  ;;  %337 = vmatpush.msra.mxu3 %v61_v6 }
  0x17   :  { %334 = vmatpush.msra.mxu2 %v58_v8  ;;  %82 = vperm.xlu1 %346, %v68_v22  }
  0x18   :  { %338 = vmatpush.msra.mxu3 %v59_v9  ;;  %320 = vmatmul.msk.f32.vlgmr.msra.gmra.mxu2 %vm90_vm0, %v57_v14 }
  0x19   :  { %72 = vperm.xlu0 %345, %v66_v11   ;;  %324 = vmatmul.msk.f32.vlgmr.msra.gmra.mxu3 %vm90_vm0, %v57_v14 }
  0x1a   :  { %281 = vperm.xlu2 %347, %v277_v35  }
  0x1d   :  { %318 = vmatmul.msk.f32.gmra.mxu0 %vm90_vm0, %v55_v12 }
  0x1e   :  { %322 = vmatmul.msk.f32.gmra.mxu1 %vm90_vm0, %v55_v12 }
  0x1f   :  { %87 = vperm.xlu1 %346, %v69_v34  }
  0x22   :  { %286 = vperm.xlu2 %347, %v278_v44  }
  0x25   :  { %319 = vmatmul.msk.f32.gmra.mxu0 %vm90_vm0, %v56_v33 }
  0x26   :  { %323 = vmatmul.msk.f32.gmra.mxu1 %vm90_vm0, %v56_v33 }
  0x83   :  { %v78_v13 = vpop.permute.xlu0 %77 }
  0x89   :  { %v83_v61 = vpop.permute.xlu1 %82 }
  0x8b   :  { %v73_v17 = vpop.permute.xlu0 %72 }
  0x91   :  { %v88_v9 = vpop.permute.xlu1 %87 }
  0x92   :  { %v120_v15 = vpop.f32.mrf.mxu0 }
  0x93   :  { %v149_v16 = vpop.f32.mrf.mxu1  ;;  %v121_v23 = vadd.f32 %v120_v15, %v73_v17 }
  0x94   :  { %v150_v24 = vadd.f32 %v149_v16, %v73_v17 }
  0x9a   :  { %v123_v18 = vpop.f32.mrf.mxu0 }
  0x9b   :  { %v152_v19 = vpop.f32.mrf.mxu1  ;;  %v124_v20 = vadd.f32 %v123_v18, %v78_v13  ;;  %v129_v59 = vpop.f32.mrf.mxu2 }
  0x9c   :  { %v153_v21 = vadd.f32 %v152_v19, %v78_v13  ;;  %v158_v60 = vpop.f32.mrf.mxu3  ;;  %v130_v14 = vadd.f32 %v129_v59, %v88_v9  ;;  %v282_v18 = vpop.permute.xlu2 %281 }
  0x9d   :  { %v176_v25 = vsel %vm175_vm1, %v124_v20, -inf  ;;  %v159_v17 = vadd.f32 %v158_v60, %v88_v9 }
  0x9e   :  { %v184_v26 = vsel %vm175_vm1, %v153_v21, -inf  ;;  %v177_v27 = vmax.f32 %v121_v23, %v176_v25 }
  0x9f   :  { %v185_v28 = vmax.f32 %v150_v24, %v184_v26  ;;  %v170_v25 = vadd.f32 %v164_v5, %v159_v17 }
  0xa0   :  { %v178_v29 = vrot.slane %v177_v27, 4 }
  0xa1   :  { %v186_v30 = vrot.slane %v185_v28, 4 }
  0xa2   :  { %v179_v31 = vmax.f32 %v177_v27, %v178_v29  ;;  %v126_v62 = vpop.f32.mrf.mxu0 }
  0xa3   :  { %v187_v32 = vmax.f32 %v185_v28, %v186_v30  ;;  %v155_v63 = vpop.f32.mrf.mxu1  ;;  %v127_v1 = vadd.f32 %v126_v62, %v83_v61 }
  0xa4   :  { %v180_v36 = vrot.slane %v179_v31, 2  ;;  %v156_v2 = vadd.f32 %v155_v63, %v83_v61  ;;  %v287_v34 = vpop.permute.xlu2 %286 }
  0xa5   :  { %v188_v37 = vrot.slane %v187_v32, 2  ;;  %v167_v7 = vadd.f32 %v163_v3, %v127_v1 }
  0xa6   :  { %v181_v38 = vmax.f32 %v179_v31, %v180_v36  ;;  %v168_v8 = vadd.f32 %v164_v5, %v156_v2  ;;  %v174_v31 = vmax.f32 %v170_v25, 0.0 }
  0xa7   :  { %v189_v39 = vmax.f32 %v187_v32, %v188_v37  ;;  %v171_v10 = vmax.f32 %v167_v7, 0.0 }
  0xa8   :  { %v182_v40 = vrot.slane %v181_v38, 1  ;;  %v172_v12 = vmax.f32 %v168_v8, 0.0 }
  0xa9   :  { %v190_v41 = vrot.slane %v189_v39, 1 }
  0xaa   :  { %v183_v42 = vmax.f32 %v181_v38, %v182_v40 }
  0xab   :  { %v191_v43 = vmax.f32 %v189_v39, %v190_v41 }
  0xac   :  { %v192_v45 = vsub.f32 %v121_v23, %v183_v42  ;;  %v194_v46 = vsub.f32 %v124_v20, %v183_v42  ;;  %v169_v23 = vadd.f32 %v163_v3, %v130_v14 }
  0xad   :  { %v193_v47 = vsub.f32 %v150_v24, %v191_v43  ;;  %v195_v48 = vsub.f32 %v153_v21, %v191_v43 }
  0xae   :  { %v200_v49 = vmul.f32 1.442695, %v194_v46  ;;  %v196_v51 = vmul.f32 1.442695, %v192_v45  ;;  %v173_v29 = vmax.f32 %v169_v23, 0.0 }
  0xaf   :  { %v202_v50 = vmul.f32 1.442695, %v195_v48  ;;  %v198_v52 = vmul.f32 1.442695, %v193_v47 }
  0xb0   :  { %348 = vpow2.f32 %v200_v49 }
  0xb1   :  { %350 = vpow2.f32 %v202_v50 }
  0xb2   :  { %352 = vpow2.f32 %v196_v51 }
  0xb3   :  { %354 = vpow2.f32 %v198_v52 }
  0xb6   :  { %v349_v53 = vpop.eup %348 }
  0xb7   :  { %v351_v54 = vpop.eup %350  ;;  %325 = vmatpush.msk.msrb.mxu2 %vm175_vm1, %v349_v53 }
  0xb8   :  { %v353_v56 = vpop.eup %352  ;;  %328 = vmatpush.msk.msrb.mxu3 %vm175_vm1, %v351_v54 }
  0xb9   :  { %v355_v57 = vpop.eup %354  ;;  %234 = vmatpush.msrb.mxu2 %v353_v56 }
  0xba   :  { %257 = vmatpush.msrb.mxu3 %v355_v57  ;;  %326 = vmatmul.msk.f32.vlgmr.msrb.gmra.mxu2 %vm206_vm2, %v204_v55 }
  0xbb   :  { %329 = vmatmul.msk.f32.vlgmr.msrb.gmra.mxu3 %vm206_vm2, %v204_v55 }
  0xc2   :  { %327 = vmatmul.msk.f32.gmra.mxu2 %vm206_vm2, %v205_v58 }
  0xc3   :  { %330 = vmatmul.msk.f32.gmra.mxu3 %vm206_vm2, %v205_v58 }
 0x13d   :  { %v236_v4 = vpop.f32.mrf.mxu2 }
 0x13e   :  { %356 = vrcp.f32 %v236_v4  ;;  %v259_v6 = vpop.f32.mrf.mxu3 }
 0x13f   :  { %358 = vrcp.f32 %v259_v6 }
 0x144   :  { %v357_v11 = vpop.eup %356 }
 0x145   :  { %v359_v13 = vpop.eup %358  ;;  %v269_v15 = vmul.f32 %v357_v11, %v353_v56  ;;  %v239_v16 = vpop.f32.mrf.mxu2 }
 0x146   :  { %v270_v19 = vmul.f32 %v359_v13, %v355_v57  ;;  %360 = vrcp.f32 %v239_v16  ;;  %v262_v20 = vpop.f32.mrf.mxu3 }
 0x147   :  { %v273_v21 = vmul.f32 %v269_v15, %v171_v10  ;;  %362 = vrcp.f32 %v262_v20 }
 0x148   :  { %v274_v22 = vmul.f32 %v270_v19, %v172_v12 }
 0x149   :  { %v289_v24 = vadd.f32 %v282_v18, %v273_v21 }
 0x14a   :  { %v290_v26 = vadd.f32 %v282_v18, %v274_v22 }
 0x14b   :  { %293 = vst [vmem:[#allocation7] sm:$0xff] %v289_v24 }
 0x14c   :  { %v361_v27 = vpop.eup %360  ;;  %294 = vst [vmem:[#allocation7 + $0x8] sm:$0xff] %v290_v26 }
 0x14d   :  { %v363_v28 = vpop.eup %362  ;;  %v271_v30 = vmul.f32 %v361_v27, %v349_v53 }
 0x14e   :  { %v272_v32 = vmul.f32 %v363_v28, %v351_v54 }
 0x14f   :  { %v275_v33 = vmul.f32 %v271_v30, %v173_v29 }
 0x150   :  { %v276_v35 = vmul.f32 %v272_v32, %v174_v31 }
 0x151   :  { %v291_v36 = vadd.f32 %v287_v34, %v275_v33 }
 0x152   :  { %v292_v37 = vadd.f32 %v287_v34, %v276_v35 }
 0x153   :  { %295 = vst [vmem:[#allocation7 + $0x10] sm:$0xf] %v291_v36 }
 0x154   :  { %296 = vst [vmem:[#allocation7 + $0x18] sm:$0xf] %v292_v37 }
 0x155   :  { %309 = dma.vmem_to_hbm [thread:$0]  %s302_s28, 512, %s304_s0, [#allocation4], %s443_s29, %s443_s29, %s444_s30  }
 0x156   :  { %440 = dma.done.wait [#allocation4], 512  }
 0x157   :  { %441 = vsyncadd [#allocation4], 4294966784 }
 0x158   :  { %314 = vsyncpa [#allocation3], 1 }
 0x159   :  { %315 = vsyncpa [#allocation6], 1 }
 0x15a   :  { %316 = vsyncpa [#allocation4], 1 }

</bundles_post_ra>
